<compile_context>
chip_gen: v6e
topology: v6e:2x2x1
jax: 0.10.0
libtpu: 0.0.40
codegen_flags: <defaults>
</compile_context>

<pallas_src>
import functools

import jax
import jax.numpy as jnp
import numpy as np
from jax.experimental import pallas as pl
from jax.experimental.pallas import tpu as pltpu


def _gaussian_kernel1d(sigma: float, ksize: int = 3) -> np.ndarray:
    """Kornia-style normalized 1D Gaussian kernel (outer product gives 2D)."""
    xs = np.arange(ksize, dtype=np.float64) - (ksize - 1) / 2.0
    g = np.exp(-(xs ** 2) / (2.0 * float(sigma) ** 2))
    return g / g.sum()


def _gaussian_kernel2d(sigma: float, ksize: int = 3) -> np.ndarray:
    g = _gaussian_kernel1d(sigma, ksize)
    return np.outer(g, g)


def _blur_kernel(mL_ref, mR_ref, mU_ref, mD_ref, x_ref, o_ref, *, g1, W, L):
    # Block shapes: x/o are (TP, L); masks are (1, L) f32 mask-weight rows
    # (edge weight g0/g2 already folded in, zero where the rolled value would
    # wrap across a row / plane boundary).  Rolls never mix sublane rows, so a
    # padded partial last block is harmless.
    x = x_ref[...].astype(jnp.float32)                         # (TP, L)

    mL = mL_ref[...]                                           # (1, L)
    mR = mR_ref[...]
    mU = mU_ref[...]
    mD = mD_ref[...]

    c = jnp.float32(g1)

    # Horizontal (W) pass: +/-1 lane rotations (XLU), mask-weights zero edges.
    row = c * x \
        + mL * pltpu.roll(x, 1, axis=1) \
        + mR * pltpu.roll(x, L - 1, axis=1)

    # Vertical (H) pass: +/-W lane rotations, mask-weights zero top/bottom rows.
    out = c * row \
        + mU * pltpu.roll(row, W, axis=1) \
        + mD * pltpu.roll(row, L - W, axis=1)

    o_ref[...] = out.astype(o_ref.dtype)


def _plane_block(P: int, L: int, itemsize: int) -> int:
    """Planes per grid step (sublane block dim)."""
    sub = {1: 32, 2: 16}.get(itemsize, 8)   # dtype-dependent sublane multiple
    if P <= sub:
        return P
    # Honest VMEM budget: double-buffered in/out pipeline tiles (input dtype)
    # plus ~7 tile-sized f32 intermediates; stays well under 32 MiB scoped VMEM.
    budget = 12 * 1024 * 1024
    bytes_per_plane = L * (itemsize * 2 * 2 + 4 * 7)
    tp_vmem = max(sub, int(budget // max(bytes_per_plane, 1)))
    # Keep >= 4 grid steps when possible (both v7x TensorCores + pipelining).
    tp_steps = max(sub, -(-P // 4))
    tp = min(tp_vmem, tp_steps, P)
    tp = max(sub, (tp // sub) * sub)
    return tp


def gaussian_blur3x3(x: jax.Array, sigma: float) -> jax.Array:
    """x: (N, C, H, W). Returns blurred array of the same shape/dtype."""
    N, C, H, W = x.shape
    P, L = N * C, H * W
    g0, g1, g2 = (float(v) for v in _gaussian_kernel1d(sigma, 3))

    # Free reshape (contiguous): lane axis becomes H*W (dense).
    x2 = x.reshape(P, L)

    # Precomputed (1, L) mask-weight rows: edge-tap weight folded into the mask.
    w_idx = np.arange(L) % W
    h_idx = np.arange(L) // W
    mL = (g0 * (w_idx != 0)).astype(np.float32).reshape(1, L)
    mR = (g2 * (w_idx != W - 1)).astype(np.float32).reshape(1, L)
    mU = (g0 * (h_idx != 0)).astype(np.float32).reshape(1, L)
    mD = (g2 * (h_idx != H - 1)).astype(np.float32).reshape(1, L)

    itemsize = jnp.dtype(x.dtype).itemsize
    tp = _plane_block(P, L, itemsize)
    grid = (pl.cdiv(P, tp),)

    mask_spec = pl.BlockSpec((1, L), lambda i: (0, 0))
    kernel = functools.partial(_blur_kernel, g1=g1, W=W, L=L)

    out = pl.pallas_call(
        kernel,
        out_shape=jax.ShapeDtypeStruct((P, L), x.dtype),
        grid=grid,
        in_specs=[mask_spec, mask_spec, mask_spec, mask_spec,
                  pl.BlockSpec((tp, L), lambda i: (i, 0))],
        out_specs=pl.BlockSpec((tp, L), lambda i: (i, 0)),
        compiler_params=pltpu.CompilerParams(
            dimension_semantics=("parallel",),
            vmem_limit_bytes=32 * 1024 * 1024,
        ),
        cost_estimate=pl.CostEstimate(
            flops=10 * P * L,
            transcendentals=0,
            bytes_accessed=2 * P * L * itemsize + 4 * L * 4,
        ),
    )(jnp.asarray(mL), jnp.asarray(mR), jnp.asarray(mU), jnp.asarray(mD), x2)
    return out.reshape(N, C, H, W)


def data_augmentation_blur(x: jax.Array, y: jax.Array, sigma: float):
    """Equivalent of DataAugmentationBlur.forward(x, y)."""
    return gaussian_blur3x3(x, sigma), y


def _reference_blur(x: np.ndarray, sigma: float) -> np.ndarray:
    """Pure-numpy reference (depthwise 3x3 correlation, zero padding)."""
    w2d = _gaussian_kernel2d(sigma, 3).astype(np.float32)
    N, C, H, W = x.shape
    xp = np.pad(x.astype(np.float32), ((0, 0), (0, 0), (1, 1), (1, 1)))
    out = np.zeros_like(x, dtype=np.float32)
    for i in range(3):
        for j in range(3):
            out += w2d[i, j] * xp[:, :, i:i + H, j:j + W]
    return out


if __name__ == "__main__":
    sigma = 1.5
    key = jax.random.PRNGKey(0)
    kx, ky = jax.random.split(key)

    x = jax.random.normal(kx, (2, 4, 16, 16), dtype=jnp.float32)
    y = jax.random.randint(ky, (2,), 0, 10, dtype=jnp.int32)

    x_blur, y_out = data_augmentation_blur(x, y, sigma)
    x_blur = jax.block_until_ready(x_blur)
    y_out = jax.block_until_ready(y_out)

    # Sanity check against numpy reference (2D kernel == separable 1D x 1D).
    ref = _reference_blur(np.asarray(x), sigma)
    np.testing.assert_allclose(np.asarray(x_blur), ref, rtol=1e-5, atol=1e-5)
    assert np.array_equal(np.asarray(y_out), np.asarray(y))

    print("KERNEL_OK")
</pallas_src>

<mosaic_0001>
module attributes {stable_mosaic.version = 11 : i64} {
  func.func @_blur_kernel(%arg0: i32, %arg1: memref<1x256xf32, #tpu.memory_space<vmem>>, %arg2: memref<1x256xf32, #tpu.memory_space<vmem>>, %arg3: memref<1x256xf32, #tpu.memory_space<vmem>>, %arg4: memref<1x256xf32, #tpu.memory_space<vmem>>, %arg5: memref<8x256xf32, #tpu.memory_space<vmem>>, %arg6: memref<8x256xf32, #tpu.memory_space<vmem>>) attributes {dimension_semantics = [#tpu.dimension_semantics<parallel>], iteration_bounds = array<i64: 1>, scalar_prefetch = 0 : i64, scratch_operands = 0 : i64, tpu.core_type = #tpu.core_type<tc>, window_params = [{pipeline_mode = #tpu.pipeline_mode<synchronous>, transform_indices = @transform_0, window_bounds = array<i64: 1, 256>}, {pipeline_mode = #tpu.pipeline_mode<synchronous>, transform_indices = @transform_1, window_bounds = array<i64: 1, 256>}, {pipeline_mode = #tpu.pipeline_mode<synchronous>, transform_indices = @transform_2, window_bounds = array<i64: 1, 256>}, {pipeline_mode = #tpu.pipeline_mode<synchronous>, transform_indices = @transform_3, window_bounds = array<i64: 1, 256>}, {transform_indices = @transform_4, window_bounds = array<i64: 8, 256>}, {transform_indices = @transform_5, window_bounds = array<i64: 8, 256>}]} {
    %c0 = arith.constant 0 : index
    %c0_0 = arith.constant 0 : index
    %0 = vector.load %arg5[%c0, %c0_0] : memref<8x256xf32, #tpu.memory_space<vmem>>, vector<8x256xf32>
    %c0_1 = arith.constant 0 : index
    %c0_2 = arith.constant 0 : index
    %1 = vector.load %arg1[%c0_1, %c0_2] : memref<1x256xf32, #tpu.memory_space<vmem>>, vector<1x256xf32>
    %c0_3 = arith.constant 0 : index
    %c0_4 = arith.constant 0 : index
    %2 = vector.load %arg2[%c0_3, %c0_4] : memref<1x256xf32, #tpu.memory_space<vmem>>, vector<1x256xf32>
    %c0_5 = arith.constant 0 : index
    %c0_6 = arith.constant 0 : index
    %3 = vector.load %arg3[%c0_5, %c0_6] : memref<1x256xf32, #tpu.memory_space<vmem>>, vector<1x256xf32>
    %c0_7 = arith.constant 0 : index
    %c0_8 = arith.constant 0 : index
    %4 = vector.load %arg4[%c0_7, %c0_8] : memref<1x256xf32, #tpu.memory_space<vmem>>, vector<1x256xf32>
    %cst = arith.constant 0.384397328 : f32
    %5 = vector.broadcast %cst : f32 to vector<8x256xf32>
    %6 = arith.mulf %5, %0 : vector<8x256xf32>
    %c1_i32 = arith.constant 1 : i32
    %7 = tpu.dynamic_rotate %0 by %c1_i32 dim 1 : vector<8x256xf32>, i32 -> vector<8x256xf32>
    %8 = vector.broadcast %1 : vector<1x256xf32> to vector<8x256xf32>
    %9 = arith.mulf %8, %7 : vector<8x256xf32>
    %10 = arith.addf %6, %9 : vector<8x256xf32>
    %c255_i32 = arith.constant 255 : i32
    %11 = tpu.dynamic_rotate %0 by %c255_i32 dim 1 : vector<8x256xf32>, i32 -> vector<8x256xf32>
    %12 = vector.broadcast %2 : vector<1x256xf32> to vector<8x256xf32>
    %13 = arith.mulf %12, %11 : vector<8x256xf32>
    %14 = arith.addf %10, %13 : vector<8x256xf32>
    %cst_9 = arith.constant 0.384397328 : f32
    %15 = vector.broadcast %cst_9 : f32 to vector<8x256xf32>
    %16 = arith.mulf %15, %14 : vector<8x256xf32>
    %c16_i32 = arith.constant 16 : i32
    %17 = tpu.dynamic_rotate %14 by %c16_i32 dim 1 : vector<8x256xf32>, i32 -> vector<8x256xf32>
    %18 = vector.broadcast %3 : vector<1x256xf32> to vector<8x256xf32>
    %19 = arith.mulf %18, %17 : vector<8x256xf32>
    %20 = arith.addf %16, %19 : vector<8x256xf32>
    %c240_i32 = arith.constant 240 : i32
    %21 = tpu.dynamic_rotate %14 by %c240_i32 dim 1 : vector<8x256xf32>, i32 -> vector<8x256xf32>
    %22 = vector.broadcast %4 : vector<1x256xf32> to vector<8x256xf32>
    %23 = arith.mulf %22, %21 : vector<8x256xf32>
    %24 = arith.addf %20, %23 : vector<8x256xf32>
    %c0_10 = arith.constant 0 : index
    %c0_11 = arith.constant 0 : index
    %25 = vector.load %arg6[%c0_10, %c0_11] : memref<8x256xf32, #tpu.memory_space<vmem>>, vector<8x256xf32>
    tpu.vector_store %arg6[%c0_10, %c0_11], %24 {strides = array<i32>} : memref<8x256xf32, #tpu.memory_space<vmem>>, vector<8x256xf32>,
    return
  }
  func.func @transform_0(%arg0: i32) -> (i32, i32) {
    %c0_i32 = arith.constant 0 : i32
    %c0_i32_0 = arith.constant 0 : i32
    %c0_i32_1 = arith.constant 0 : i32
    return %c0_i32, %c0_i32_0 : i32, i32
  }
  func.func @transform_1(%arg0: i32) -> (i32, i32) {
    %c0_i32 = arith.constant 0 : i32
    %c0_i32_0 = arith.constant 0 : i32
    %c0_i32_1 = arith.constant 0 : i32
    return %c0_i32, %c0_i32_0 : i32, i32
  }
  func.func @transform_2(%arg0: i32) -> (i32, i32) {
    %c0_i32 = arith.constant 0 : i32
    %c0_i32_0 = arith.constant 0 : i32
    %c0_i32_1 = arith.constant 0 : i32
    return %c0_i32, %c0_i32_0 : i32, i32
  }
  func.func @transform_3(%arg0: i32) -> (i32, i32) {
    %c0_i32 = arith.constant 0 : i32
    %c0_i32_0 = arith.constant 0 : i32
    %c0_i32_1 = arith.constant 0 : i32
    return %c0_i32, %c0_i32_0 : i32, i32
  }
  func.func @transform_4(%arg0: i32) -> (i32, i32) {
    %c0_i32 = arith.constant 0 : i32
    %c0_i32_0 = arith.constant 0 : i32
    return %arg0, %c0_i32 : i32, i32
  }
  func.func @transform_5(%arg0: i32) -> (i32, i32) {
    %c0_i32 = arith.constant 0 : i32
    %c0_i32_0 = arith.constant 0 : i32
    return %arg0, %c0_i32 : i32, i32
  }
}

</mosaic_0001>

<bundles_post_ra>
// kernel: tpu_custom_call.1
= control target key start
LH: loop header
LB: loop body
LE: loop exit
PB: predicated region body
PF: predicated region fallthrough
CT: control target
= control target key end

     0   :  { %10 = vsyncpa [#allocation3], 0  ;;  %s324_s0 = inlined_call_operand.hbm [shape: f32[1,256], index: 0, kind: input, shape index: {}]   ;;  %s325_s1 = inlined_call_operand.hbm [shape: f32[1,256], index: 1, kind: input, shape index: {}]   ;;  %s326_s2 = inlined_call_operand.vmem [shape: f32[1,256], index: 2, kind: input, shape index: {}]   ;;  %s327_s3 = inlined_call_operand.vmem [shape: f32[1,256], index: 3, kind: input, shape index: {}]   ;;  %s328_s4 = inlined_call_operand.hbm [shape: f32[8,256], index: 4, kind: input, shape index: {}]   ;;  %s329_s5 = inlined_call_operand.hbm [shape: f32[8,256], index: 5, kind: output, shape index: {}]  }
   0x1   :  { %11 = vsyncpa [#allocation6], 0 }
   0x2   :  { %12 = vsyncpa [#allocation4], 0  ;;  %s268_s18 = smov [#allocation5]   ;;  %s269_s20 = smov [#allocation2]  }
   0x3   :  { %s29_s19 = sshll.u32 %s268_s18, 4  ;;  %s19_s21 = sshll.u32 %s269_s20, 4  ;;  %s30_s19 = int_to_ptr.vmem [resolvable:$true] %s29_s19  ;;  %s20_s21 = int_to_ptr.vmem [resolvable:$true] %s19_s21 }
   0x4   :  { %s190_s22 = scalar_lea.vmem %s30_s19, 32  ;;  %p195_p1 = scmp.lt.s32.totalorder %s30_s19, %s30_s19 }
   0x5   :  { %p191_p0 = scmp.ne.s32.totalorder %s30_s19, %s190_s22  ;;  %p196_p2 = scmp.lt.s32.totalorder %s190_s22, %s190_s22 }
   0x7   :  { %p197_p3 = por %p196_p2, %p195_p1 }
   0x9   :  { %p198_p4 = pnand %p197_p3, %p191_p0 }
   0xb   :  { %201 = shalt.err (!%p198_p4)
}
   0xc   :  { %32 = dma.hbm_to_vmem [thread:$0]  %s325_s1, 32, %s30_s19, [#allocation6]  }
   0xd   :  { %s210_s25 = scalar_lea.vmem %s20_s21, 32  ;;  %p215_p6 = scmp.lt.s32.totalorder %s20_s21, %s20_s21 }
   0xe   :  { %p211_p5 = scmp.ne.s32.totalorder %s20_s21, %s210_s25  ;;  %p216_p7 = scmp.lt.s32.totalorder %s210_s25, %s210_s25 }
  0x10   :  { %p217_p8 = por %p216_p7, %p215_p6 }
  0x12   :  { %p218_p9 = pnand %p217_p8, %p211_p5 }
  0x14   :  { %221 = shalt.err (!%p218_p9)
}
  0x15   :  { %22 = dma.hbm_to_vmem [thread:$0]  %s324_s0, 32, %s20_s21, [#allocation3]  }
  0x16   :  { %s270_s28 = smov [#allocation7]  }
  0x17   :  { %s43_s29 = sshll.u32 %s270_s28, 4  ;;  %s44_s29 = int_to_ptr.vmem [resolvable:$true] %s43_s29 }
  0x18   :  { %s230_s30 = scalar_lea.vmem %s44_s29, 256  ;;  %p235_p11 = scmp.lt.s32.totalorder %s44_s29, %s44_s29 }
  0x19   :  { %p231_p10 = scmp.ne.s32.totalorder %s44_s29, %s230_s30  ;;  %p236_p12 = scmp.lt.s32.totalorder %s230_s30, %s230_s30 }
  0x1b   :  { %p237_p13 = por %p236_p12, %p235_p11 }
  0x1d   :  { %p238_p0 = pnand %p237_p13, %p231_p10 }
  0x1f   :  { %241 = shalt.err (!%p238_p0)
}
  0x20   :  { %46 = dma.hbm_to_vmem [thread:$0]  %s328_s4, 256, %s44_s29, [#allocation6]  }
  0x21   :  { %262 = dma.done.wait [#allocation3], 32  }
  0x22   :  { %263 = vsyncadd [#allocation3], 4294967264 }
  0x23   :  { %264 = dma.done.wait [#allocation6], 288  }
  0x24   :  { %265 = vsyncadd [#allocation6], 4294967008  ;;  %v56_v0 = vld [vmem:[#allocation7] sm:$0xff]  ;;  %s271_s0 = smov 127   ;;  %s272_s7 = smov 1   ;;  %v57_v1 = vld [vmem:[#allocation7 + $0x8] sm:$0xff]  ;;  %v68_v2 = vlaneseq }
  0x25   :  { %88 = vrot.lane.b32.xlu1 %v56_v0, %s271_s0  ;;  %64 = vrot.lane.b32.xlu0 %v56_v0, %s272_s7  ;;  %v58_v7 = vld [vmem:[#allocation2] sm:$0x3]  ;;  %v59_v10 = vld [vmem:[#allocation5] sm:$0x3]  ;;  %v62_v13 = vmul.f32 0.38439733, %v56_v0 }
  0x26   :  { %v75_v3 = vshrl.u32 %v68_v2, 7  ;;  %v69_v4 = vand.u32 127, %v68_v2  ;;  %v63_v14 = vmul.f32 0.38439733, %v57_v1  ;;  %s273_s4 = smov 16   ;;  %s274_s8 = smov 112  }
  0x27   :  { %v60_v31 = vld [vmem:[%s326_s2] sm:$0x3]  ;;  %s275_s2 = smov [#allocation8]  }
  0x28   :  { %v76_v5 = vsub.s32 0, %v75_v3  ;;  %v80_v6 = vsub.s32 1, %v75_v3  ;;  %vm92_vm0 = vcmp.lt.s32.totalorder %v69_v4, 127  ;;  %vm70_vm1 = vcmp.lt.s32.totalorder %v69_v4, 1  ;;  %v61_v34 = vld [vmem:[%s327_s3] sm:$0x3] }
  0x29   :  { %90 = vrot.lane.b32.xlu1 %v57_v1, %s271_s0  ;;  %66 = vrot.lane.b32.xlu0 %v57_v1, %s272_s7  ;;  %vm116_vm2 = vcmp.lt.s32.totalorder %v69_v4, 16  ;;  %vm138_vm3 = vcmp.lt.s32.totalorder %v69_v4, 112  ;;  %s164_s13 = sshll.u32 %s275_s2, 4  ;;  %s165_s13 = int_to_ptr.vmem [resolvable:$true] %s164_s13 }
  0x2a   :  { %v77_v11 = vrot.slane %v58_v7, %v76_v5  ;;  %v81_v12 = vrot.slane %v58_v7, %v80_v6  ;;  %v99_v15 = vrot.slane %v59_v10, %v76_v5  ;;  %v103_v16 = vrot.slane %v59_v10, %v80_v6  ;;  %s242_s3 = scalar_lea.vmem %s165_s13, 256  ;;  %p247_p2 = scmp.lt.s32.totalorder %s165_s13, %s165_s13 }
  0x2b   :  { %v123_v32 = vrot.slane %v60_v31, %v76_v5  ;;  %v127_v33 = vrot.slane %v60_v31, %v80_v6  ;;  %v145_v41 = vrot.slane %v61_v34, %v76_v5  ;;  %v149_v42 = vrot.slane %v61_v34, %v80_v6  ;;  %p243_p1 = scmp.ne.s32.totalorder %s165_s13, %s242_s3  ;;  %p248_p3 = scmp.lt.s32.totalorder %s242_s3, %s242_s3 }
  0x2d   :  { %p249_p4 = por %p248_p3, %p247_p2 }
  0x2f   :  { %p250_p5 = pnand %p249_p4, %p243_p1 }
  0x97   :  { %v89_v8 = vpop.permute.xlu1 %88  ;;  %v65_v9 = vpop.permute.xlu0 %64 }
  0x9b   :  { %v91_v17 = vpop.permute.xlu1 %90  ;;  %v67_v18 = vpop.permute.xlu0 %66 }
  0x9c   :  { %v93_v19 = vsel %vm92_vm0, %v89_v8, %v91_v17  ;;  %v94_v20 = vsel %vm92_vm0, %v91_v17, %v89_v8  ;;  %v71_v21 = vsel %vm70_vm1, %v65_v9, %v67_v18  ;;  %v72_v22 = vsel %vm70_vm1, %v67_v18, %v65_v9 }
  0x9d   :  { %v84_v23 = vmul.f32 %v77_v11, %v72_v22  ;;  %v85_v24 = vmul.f32 %v81_v12, %v71_v21  ;;  %v106_v25 = vmul.f32 %v99_v15, %v93_v19  ;;  %v107_v26 = vmul.f32 %v103_v16, %v94_v20 }
  0x9f   :  { %v86_v27 = vadd.f32 %v84_v23, %v62_v13  ;;  %v87_v28 = vadd.f32 %v85_v24, %v63_v14 }
  0xa1   :  { %v109_v29 = vadd.f32 %v107_v26, %v87_v28  ;;  %v108_v30 = vadd.f32 %v106_v25, %v86_v27 }
  0xa3   :  { %114 = vrot.lane.b32.xlu1 %v109_v29, %s273_s4  ;;  %112 = vrot.lane.b32.xlu0 %v108_v30, %s273_s4  ;;  %v111_v43 = vmul.f32 0.38439733, %v109_v29  ;;  %v110_v44 = vmul.f32 0.38439733, %v108_v30 }
  0xa7   :  { %136 = vrot.lane.b32.xlu1 %v109_v29, %s274_s8  ;;  %134 = vrot.lane.b32.xlu0 %v108_v30, %s274_s8 }
 0x115   :  { %v115_v35 = vpop.permute.xlu1 %114  ;;  %v113_v36 = vpop.permute.xlu0 %112 }
 0x116   :  { %v117_v37 = vsel %vm116_vm2, %v113_v36, %v115_v35  ;;  %v118_v38 = vsel %vm116_vm2, %v115_v35, %v113_v36 }
 0x117   :  { %v130_v39 = vmul.f32 %v123_v32, %v118_v38  ;;  %v131_v40 = vmul.f32 %v127_v33, %v117_v37 }
 0x119   :  { %v137_v45 = vpop.permute.xlu1 %136  ;;  %v135_v46 = vpop.permute.xlu0 %134  ;;  %v132_v49 = vadd.f32 %v130_v39, %v110_v44  ;;  %v133_v50 = vadd.f32 %v131_v40, %v111_v43 }
 0x11a   :  { %v139_v47 = vsel %vm138_vm3, %v135_v46, %v137_v45  ;;  %v140_v48 = vsel %vm138_vm3, %v137_v45, %v135_v46 }
 0x11b   :  { %v152_v51 = vmul.f32 %v145_v41, %v139_v47  ;;  %v153_v52 = vmul.f32 %v149_v42, %v140_v48 }
 0x11d   :  { %v154_v53 = vadd.f32 %v152_v51, %v132_v49  ;;  %v155_v54 = vadd.f32 %v153_v52, %v133_v50 }
 0x11f   :  { %156 = vst [vmem:[#allocation8] sm:$0xff] %v154_v53  ;;  %157 = vst [vmem:[#allocation8 + $0x8] sm:$0xff] %v155_v54 }
 0x120   :  { %253 = shalt.err (!%p250_p5)
}
 0x121   :  { %167 = dma.vmem_to_hbm [thread:$0]  %s165_s13, 256, %s329_s5, [#allocation4]  }
 0x122   :  { %266 = dma.done.wait [#allocation4], 256  }
 0x123   :  { %267 = vsyncadd [#allocation4], 4294967040 }
 0x124   :  { %171 = vsyncpa [#allocation3], 1 }
 0x125   :  { %172 = vsyncpa [#allocation6], 1 }
 0x126   :  { %173 = vsyncpa [#allocation4], 1 }

</bundles_post_ra>
